<compile_context>
chip_gen: v5e
topology: v5e:2x2
jax: 0.10.0
libtpu: 0.0.40
codegen_flags: <defaults>
</compile_context>

<pallas_src>
import functools

import jax
import jax.numpy as jnp
from jax.experimental import pallas as pl
from jax.experimental.pallas import tpu as pltpu

HIDDEN = 64          # logical hidden width (matches the PyTorch module)
HIDDEN_PAD = 128     # lane-padded width used inside the kernel


def qnetwork_kernel(x_ref, w1_ref, w23_ref, b_ref, o_ref):
    """Fused 3-layer MLP forward for one batch tile. All operands live in VMEM."""
    x = x_ref[...]                                    # (bt, S)   bf16
    b = b_ref[...]                                    # (3, 128)  f32

    # Layer 1: Linear(S, 128pad) + ReLU   (MXU bf16 matmul, f32 accumulate; VPU ReLU)
    h1 = jnp.dot(x, w1_ref[...], preferred_element_type=jnp.float32) + b[0:1, :]
    h1 = jnp.maximum(h1, 0.0)

    # Layer 2: Linear(128pad, 128pad) + ReLU
    h2 = jnp.dot(h1.astype(jnp.bfloat16), w23_ref[0],
                 preferred_element_type=jnp.float32) + b[1:2, :]
    h2 = jnp.maximum(h2, 0.0)

    # Layer 3: Linear(128pad, 128pad)  (only the first `action_size` lanes are real)
    out = jnp.dot(h2.astype(jnp.bfloat16), w23_ref[1],
                  preferred_element_type=jnp.float32) + b[2:3, :]
    o_ref[...] = out


def init_params(key, state_size, action_size):
    """torch.nn.Linear-style init (U[-1/sqrt(fan_in), 1/sqrt(fan_in)]).
    Weights stored transposed as [in_features, out_features]; biases 1-D."""
    dims = [(state_size, HIDDEN), (HIDDEN, HIDDEN), (HIDDEN, action_size)]
    params = []
    for fan_in, fan_out in dims:
        key, kw, kb = jax.random.split(key, 3)
        bound = 1.0 / jnp.sqrt(jnp.float32(fan_in))
        w = jax.random.uniform(kw, (fan_in, fan_out), jnp.float32, -bound, bound)
        b = jax.random.uniform(kb, (fan_out,), jnp.float32, -bound, bound)
        params.extend([w, b])
    return tuple(params)


def pack_params(params):
    """Zero-pad everything to 128 lanes and pack into 3 kernel operands
    (bf16 weights for the MXU, f32 biases for the f32 bias-add)."""
    w1, b1, w2, b2, w3, b3 = params
    S, H = w1.shape
    A = w3.shape[1]
    w1p = jnp.zeros((S, HIDDEN_PAD), jnp.bfloat16).at[:, :H].set(w1.astype(jnp.bfloat16))
    w2p = jnp.zeros((HIDDEN_PAD, HIDDEN_PAD), jnp.bfloat16).at[:H, :H].set(
        w2.astype(jnp.bfloat16))
    w3p = jnp.zeros((HIDDEN_PAD, HIDDEN_PAD), jnp.bfloat16).at[:H, :A].set(
        w3.astype(jnp.bfloat16))
    bp = (jnp.zeros((3, HIDDEN_PAD), jnp.float32)
          .at[0, :H].set(b1).at[1, :H].set(b2).at[2, :A].set(b3))
    return w1p, jnp.stack([w2p, w3p]), bp


@functools.partial(jax.jit, static_argnames=("batch_tile",))
def qnetwork_forward(x, params, batch_tile=None):
    """Runs the fused MLP. x: [B, state_size] float32 -> [B, action_size] float32."""
    B, S = x.shape
    A = params[4].shape[1]

    if batch_tile is None:
        # Small batch: single full-array block (one grid step, no partial-tile rules).
        # Large batch: 512-row tiles -> multiple of 128 (v5e MXU) and 256 (v6e/v7x MXU),
        # amortizes the ~0.35us/step overhead, and gives >=2 tiles so v7x's two
        # TensorCores both get work via the "parallel" batch axis.
        batch_tile = B if B <= 512 else 512
    n_tiles = pl.cdiv(B, batch_tile)

    w1p, w23p, bp = pack_params(params)
    xb = x.astype(jnp.bfloat16)

    flops = 2 * B * (S * HIDDEN_PAD + 2 * HIDDEN_PAD * HIDDEN_PAD)
    bytes_accessed = (xb.size * 2 + w1p.size * 2 + w23p.size * 2 + bp.size * 4
                      + B * HIDDEN_PAD * 4)

    out_pad = pl.pallas_call(
        qnetwork_kernel,
        out_shape=jax.ShapeDtypeStruct((B, HIDDEN_PAD), jnp.float32),
        grid=(n_tiles,),
        in_specs=[
            pl.BlockSpec((batch_tile, S), lambda i: (i, 0)),    # x batch tile
            pl.BlockSpec(w1p.shape, lambda i: (0, 0)),          # w1 (resident)
            pl.BlockSpec(w23p.shape, lambda i: (0, 0, 0)),      # stacked w2/w3 (resident)
            pl.BlockSpec(bp.shape, lambda i: (0, 0)),           # stacked biases (resident)
        ],
        out_specs=pl.BlockSpec((batch_tile, HIDDEN_PAD), lambda i: (i, 0)),
        compiler_params=pltpu.CompilerParams(
            dimension_semantics=("parallel",)),
        cost_estimate=pl.CostEstimate(
            flops=flops, transcendentals=0, bytes_accessed=bytes_accessed),
    )(xb, w1p, w23p, bp)

    # Only the first A lanes carry real Q-values; the padded lanes are exact zeros + b3 pad (=0).
    return out_pad[:, :A]


def reference_forward(x, params):
    """Plain-JAX reference with the same bf16-input / f32-accumulate numerics."""
    w1, b1, w2, b2, w3, b3 = params
    f = lambda a: a.astype(jnp.bfloat16).astype(jnp.float32)
    h = jnp.maximum(jnp.dot(f(x), f(w1)) + b1, 0.0)
    h = jnp.maximum(jnp.dot(f(h), f(w2)) + b2, 0.0)
    return jnp.dot(f(h), f(w3)) + b3


if __name__ == "__main__":
    state_size = 8
    action_size = 4
    batch = 128   # small demo batch -> single grid step; large batches tile at 512 rows

    key = jax.random.PRNGKey(0)
    key, kx = jax.random.split(key)
    x = jax.random.normal(kx, (batch, state_size), jnp.float32)
    params = init_params(key, state_size, action_size)

    out = qnetwork_forward(x, params)
    out = jax.block_until_ready(out)

    ref = reference_forward(x, params)
    assert out.shape == (batch, action_size), out.shape
    assert jnp.allclose(out, ref, atol=1e-3, rtol=1e-3), (
        float(jnp.max(jnp.abs(out - ref))))

    print("KERNEL_OK")
</pallas_src>

<mosaic_0001>
module attributes {stable_mosaic.version = 11 : i64} {
  func.func @qnetwork_kernel(%arg0: i32, %arg1: memref<128x8xbf16, #tpu.memory_space<vmem>>, %arg2: memref<8x128xbf16, #tpu.memory_space<vmem>>, %arg3: memref<2x128x128xbf16, #tpu.memory_space<vmem>>, %arg4: memref<3x128xf32, #tpu.memory_space<vmem>>, %arg5: memref<128x128xf32, #tpu.memory_space<vmem>>) attributes {dimension_semantics = [#tpu.dimension_semantics<parallel>], iteration_bounds = array<i64: 1>, scalar_prefetch = 0 : i64, scratch_operands = 0 : i64, tpu.core_type = #tpu.core_type<tc>, window_params = [{transform_indices = @transform_0, window_bounds = array<i64: 128, 8>}, {pipeline_mode = #tpu.pipeline_mode<synchronous>, transform_indices = @transform_1, window_bounds = array<i64: 8, 128>}, {pipeline_mode = #tpu.pipeline_mode<synchronous>, transform_indices = @transform_2, window_bounds = array<i64: 2, 128, 128>}, {pipeline_mode = #tpu.pipeline_mode<synchronous>, transform_indices = @transform_3, window_bounds = array<i64: 3, 128>}, {transform_indices = @transform_4, window_bounds = array<i64: 128, 128>}]} {
    %c0 = arith.constant 0 : index
    %c0_0 = arith.constant 0 : index
    %0 = vector.load %arg1[%c0, %c0_0] : memref<128x8xbf16, #tpu.memory_space<vmem>>, vector<128x8xbf16>
    %c0_1 = arith.constant 0 : index
    %c0_2 = arith.constant 0 : index
    %1 = vector.load %arg4[%c0_1, %c0_2] : memref<3x128xf32, #tpu.memory_space<vmem>>, vector<3x128xf32>
    %c0_3 = arith.constant 0 : index
    %c0_4 = arith.constant 0 : index
    %2 = vector.load %arg2[%c0_3, %c0_4] : memref<8x128xbf16, #tpu.memory_space<vmem>>, vector<8x128xbf16>
    %cst = arith.constant dense<0.000000e+00> : vector<128x128xf32>
    %3 = tpu.matmul %0, %2, %cst {dimension_numbers = #tpu.dot_dimension_numbers<[1], [0], [0], [1], [0, 0, 1, 1], [], []>} : vector<128x8xbf16>, vector<8x128xbf16>, vector<128x128xf32> -> vector<128x128xf32>
    %4 = vector.extract_strided_slice %1 {offsets = [0, 0], sizes = [1, 128], strides = [1, 1]} : vector<3x128xf32> to vector<1x128xf32>
    %5 = vector.broadcast %4 : vector<1x128xf32> to vector<128x128xf32>
    %6 = arith.addf %3, %5 : vector<128x128xf32>
    %cst_5 = arith.constant 0.000000e+00 : f32
    %7 = vector.broadcast %cst_5 : f32 to vector<128x128xf32>
    %8 = arith.maximumf %6, %7 : vector<128x128xf32>
    %9 = arith.truncf %8 : vector<128x128xf32> to vector<128x128xbf16>
    %c0_6 = arith.constant 0 : index
    %c0_7 = arith.constant 0 : index
    %c0_8 = arith.constant 0 : index
    %10 = vector.load %arg3[%c0_6, %c0_7, %c0_8] : memref<2x128x128xbf16, #tpu.memory_space<vmem>>, vector<1x128x128xbf16>
    %11 = vector.shape_cast %10 : vector<1x128x128xbf16> to vector<128x128xbf16>
    %cst_9 = arith.constant dense<0.000000e+00> : vector<128x128xf32>
    %12 = tpu.matmul %9, %11, %cst_9 {dimension_numbers = #tpu.dot_dimension_numbers<[1], [0], [0], [1], [0, 0, 1, 1], [], []>} : vector<128x128xbf16>, vector<128x128xbf16>, vector<128x128xf32> -> vector<128x128xf32>
    %13 = vector.extract_strided_slice %1 {offsets = [1, 0], sizes = [1, 128], strides = [1, 1]} : vector<3x128xf32> to vector<1x128xf32>
    %14 = vector.broadcast %13 : vector<1x128xf32> to vector<128x128xf32>
    %15 = arith.addf %12, %14 : vector<128x128xf32>
    %cst_10 = arith.constant 0.000000e+00 : f32
    %16 = vector.broadcast %cst_10 : f32 to vector<128x128xf32>
    %17 = arith.maximumf %15, %16 : vector<128x128xf32>
    %18 = arith.truncf %17 : vector<128x128xf32> to vector<128x128xbf16>
    %c1 = arith.constant 1 : index
    %c0_11 = arith.constant 0 : index
    %c0_12 = arith.constant 0 : index
    %19 = vector.load %arg3[%c1, %c0_11, %c0_12] : memref<2x128x128xbf16, #tpu.memory_space<vmem>>, vector<1x128x128xbf16>
    %20 = vector.shape_cast %19 : vector<1x128x128xbf16> to vector<128x128xbf16>
    %cst_13 = arith.constant dense<0.000000e+00> : vector<128x128xf32>
    %21 = tpu.matmul %18, %20, %cst_13 {dimension_numbers = #tpu.dot_dimension_numbers<[1], [0], [0], [1], [0, 0, 1, 1], [], []>} : vector<128x128xbf16>, vector<128x128xbf16>, vector<128x128xf32> -> vector<128x128xf32>
    %22 = vector.extract_strided_slice %1 {offsets = [2, 0], sizes = [1, 128], strides = [1, 1]} : vector<3x128xf32> to vector<1x128xf32>
    %23 = vector.broadcast %22 : vector<1x128xf32> to vector<128x128xf32>
    %24 = arith.addf %21, %23 : vector<128x128xf32>
    %c0_14 = arith.constant 0 : index
    %c0_15 = arith.constant 0 : index
    %25 = vector.load %arg5[%c0_14, %c0_15] : memref<128x128xf32, #tpu.memory_space<vmem>>, vector<128x128xf32>
    tpu.vector_store %arg5[%c0_14, %c0_15], %24 {strides = array<i32>} : memref<128x128xf32, #tpu.memory_space<vmem>>, vector<128x128xf32>,
    return
  }
  func.func @transform_0(%arg0: i32) -> (i32, i32) {
    %c0_i32 = arith.constant 0 : i32
    %c0_i32_0 = arith.constant 0 : i32
    return %arg0, %c0_i32 : i32, i32
  }
  func.func @transform_1(%arg0: i32) -> (i32, i32) {
    %c0_i32 = arith.constant 0 : i32
    %c0_i32_0 = arith.constant 0 : i32
    %c0_i32_1 = arith.constant 0 : i32
    return %c0_i32, %c0_i32_0 : i32, i32
  }
  func.func @transform_2(%arg0: i32) -> (i32, i32, i32) {
    %c0_i32 = arith.constant 0 : i32
    %c0_i32_0 = arith.constant 0 : i32
    %c0_i32_1 = arith.constant 0 : i32
    %c0_i32_2 = arith.constant 0 : i32
    return %c0_i32, %c0_i32_0, %c0_i32_1 : i32, i32, i32
  }
  func.func @transform_3(%arg0: i32) -> (i32, i32) {
    %c0_i32 = arith.constant 0 : i32
    %c0_i32_0 = arith.constant 0 : i32
    %c0_i32_1 = arith.constant 0 : i32
    return %c0_i32, %c0_i32_0 : i32, i32
  }
  func.func @transform_4(%arg0: i32) -> (i32, i32) {
    %c0_i32 = arith.constant 0 : i32
    %c0_i32_0 = arith.constant 0 : i32
    return %arg0, %c0_i32 : i32, i32
  }
}

</mosaic_0001>

<bundles_post_ra>
// kernel: qnetwork_forward.1
= control target key start
LH: loop header
LB: loop body
LE: loop exit
PB: predicated region body
PF: predicated region fallthrough
CT: control target
= control target key end

     0   :  { %vm102_vm0 = vcmask 1043456   ;;  %vm77_vm1 = vcmask 64512   ;;  %s794_s1 = inlined_call_operand.vmem [shape: bf16[8,128], index: 1, kind: input, shape index: {}]   ;;  %s795_s0 = inlined_call_operand.vmem [shape: bf16[128,8], index: 0, kind: input, shape index: {}]   ;;  %s796_s2 = inlined_call_operand.vmem [shape: bf16[2,128,128], index: 2, kind: input, shape index: {}]   ;;  %s797_s3 = inlined_call_operand.vmem [shape: f32[3,128], index: 3, kind: input, shape index: {}]   ;;  %s798_s4 = inlined_call_operand.vmem [shape: f32[128,128], index: 4, kind: output, shape index: {}]  }
   0x1   :  { %v35_v0 = vld [vmem:[%s794_s1] sm:$0xf]  ;;  %v573_v3 = vld [vmem:[%s795_s0 + $0x8] sm:$0xff]  ;;  %v574_v4 = vld [vmem:[%s795_s0 + $0x10] sm:$0xff] }
   0x2   :  { %v104_v1 = vsel %vm102_vm0, %v35_v0, 0  ;;  %v572_v2 = vld [vmem:[%s795_s0] sm:$0xff]  ;;  %v575_v5 = vld [vmem:[%s795_s0 + $0x18] sm:$0xff]  ;;  %v577_v8 = vld [vmem:[%s795_s0 + $0x28] sm:$0xff] }
   0x3   :  { %113 = vmatpush.bf16.msra.mxu0 %v104_v1  ;;  %v576_v6 = vld [vmem:[%s795_s0 + $0x20] sm:$0xff]  ;;  %v587_v7 = vld [vmem:[%s796_s2 + $0x38] sm:$0xff]  ;;  %v586_v9 = vld [vmem:[%s796_s2 + $0x30] sm:$0xff] }
   0x4   :  { %244 = vmatpush.bf16.msra.mxu1 %v587_v7  ;;  %596 = vmatpush.bf16.msra.mxu3 %v587_v7  ;;  %v585_v10 = vld [vmem:[%s796_s2 + $0x28] sm:$0xff]  ;;  %v584_v11 = vld [vmem:[%s796_s2 + $0x20] sm:$0xff]  ;;  %v583_v12 = vld [vmem:[%s796_s2 + $0x18] sm:$0xff] }
   0x5   :  { %v578_v13 = vld [vmem:[%s795_s0 + $0x30] sm:$0xff]  ;;  %v581_v15 = vld [vmem:[%s796_s2 + $0x8] sm:$0xff]  ;;  %v580_v16 = vld [vmem:[%s796_s2] sm:$0xff] }
   0x6   :  { %484 = vmatmul.msk.bf16.vlgmr.msra.gmra.mxu0 %vm77_vm1, %v572_v2  ;;  %v582_v14 = vld [vmem:[%s796_s2 + $0x10] sm:$0xff]  ;;  %v579_v17 = vld [vmem:[%s795_s0 + $0x38] sm:$0xff]  ;;  %v699_v18 = vld [vmem:[%s797_s3] sm:$0x7] }
   0x7   :  { %v702_v20 = vperm.slane %v699_v18, 0  ;;  %v595_v59 = vld [vmem:[%s796_s2 + $0x78] sm:$0xff]  ;;  %v594_v63 = vld [vmem:[%s796_s2 + $0x70] sm:$0xff]  ;;  %v593_v1 = vld [vmem:[%s796_s2 + $0x68] sm:$0xff] }
   0x8   :  { %245 = vmatpush.bf16.msra.mxu1 %v586_v9  ;;  %597 = vmatpush.bf16.msra.mxu3 %v586_v9  ;;  %v592_v2 = vld [vmem:[%s796_s2 + $0x60] sm:$0xff] }
   0x9   :  { %383 = vmatpush.bf16.msra.mxu2 %v595_v59 }
   0xc   :  { %246 = vmatpush.bf16.msra.mxu1 %v585_v10  ;;  %598 = vmatpush.bf16.msra.mxu3 %v585_v10  ;;  %v590_v10 = vld [vmem:[%s796_s2 + $0x50] sm:$0xff] }
   0xd   :  { %384 = vmatpush.bf16.msra.mxu2 %v594_v63 }
  0x10   :  { %247 = vmatpush.bf16.msra.mxu1 %v584_v11  ;;  %599 = vmatpush.bf16.msra.mxu3 %v584_v11 }
  0x11   :  { %385 = vmatpush.bf16.msra.mxu2 %v593_v1 }
  0x14   :  { %248 = vmatpush.bf16.msra.mxu1 %v583_v12  ;;  %600 = vmatpush.bf16.msra.mxu3 %v583_v12  ;;  %v589_v12 = vld [vmem:[%s796_s2 + $0x48] sm:$0xff] }
  0x15   :  { %386 = vmatpush.bf16.msra.mxu2 %v592_v2 }
  0x16   :  { %485 = vmatmul.msk.bf16.gmra.mxu0 %vm77_vm1, %v573_v3 }
  0x18   :  { %249 = vmatpush.bf16.msra.mxu1 %v582_v14  ;;  %601 = vmatpush.bf16.msra.mxu3 %v582_v14 }
  0x1c   :  { %250 = vmatpush.bf16.msra.mxu1 %v581_v15  ;;  %602 = vmatpush.bf16.msra.mxu3 %v581_v15 }
  0x20   :  { %251 = vmatpush.bf16.msra.mxu1 %v580_v16  ;;  %603 = vmatpush.bf16.msra.mxu3 %v580_v16 }
  0x24   :  { %604 = vmatpush.bf16.msrb.mxu3 %v595_v59 }
  0x26   :  { %486 = vmatmul.msk.bf16.gmra.mxu0 %vm77_vm1, %v574_v4 }
  0x28   :  { %605 = vmatpush.bf16.msrb.mxu3 %v594_v63 }
  0x2c   :  { %606 = vmatpush.bf16.msrb.mxu3 %v593_v1 }
  0x30   :  { %607 = vmatpush.bf16.msrb.mxu3 %v592_v2 }
  0x36   :  { %487 = vmatmul.msk.bf16.gmra.mxu0 %vm77_vm1, %v575_v5 }
  0x46   :  { %488 = vmatmul.msk.bf16.gmra.mxu0 %vm77_vm1, %v576_v6  ;;  %v591_v6 = vld [vmem:[%s796_s2 + $0x58] sm:$0xff] }
  0x47   :  { %387 = vmatpush.bf16.msra.mxu2 %v591_v6  ;;  %608 = vmatpush.bf16.msrb.mxu3 %v591_v6 }
  0x4b   :  { %388 = vmatpush.bf16.msra.mxu2 %v590_v10  ;;  %609 = vmatpush.bf16.msrb.mxu3 %v590_v10 }
  0x4f   :  { %389 = vmatpush.bf16.msra.mxu2 %v589_v12  ;;  %610 = vmatpush.bf16.msrb.mxu3 %v589_v12 }
  0x56   :  { %489 = vmatmul.msk.bf16.gmra.mxu0 %vm77_vm1, %v577_v8 }
  0x66   :  { %490 = vmatmul.msk.bf16.gmra.mxu0 %vm77_vm1, %v578_v13  ;;  %v588_v13 = vld [vmem:[%s796_s2 + $0x40] sm:$0xff] }
  0x67   :  { %390 = vmatpush.bf16.msra.mxu2 %v588_v13  ;;  %611 = vmatpush.bf16.msrb.mxu3 %v588_v13 }
  0x76   :  { %491 = vmatmul.msk.bf16.gmra.mxu0 %vm77_vm1, %v579_v17 }
  0x83   :  { %v115_v19 = vpop.f32.mrf.mxu0 }
  0x84   :  { %v116_v21 = vadd.f32 %v115_v19, %v702_v20 }
  0x86   :  { %v155_v24 = vmax.f32 %v116_v21, 0.0 }
  0x8b   :  { %v117_v22 = vpop.f32.mrf.mxu0 }
  0x8c   :  { %v118_v23 = vadd.f32 %v117_v22, %v702_v20 }
  0x8e   :  { %v156_v25 = vmax.f32 %v118_v23, 0.0  ;;  %v195_v23 = vperm.slane %v699_v18, 1 }
  0x90   :  { %v171_v26 = vpack.c.bf16 %v156_v25, %v155_v24 }
  0x92   :  { %252 = vmatmul.bf16.vlgmr.msra.gmra.mxu1 %v171_v26 }
  0x93   :  { %v120_v27 = vpop.f32.mrf.mxu0 }
  0x94   :  { %v121_v28 = vadd.f32 %v120_v27, %v702_v20 }
  0x96   :  { %v157_v31 = vmax.f32 %v121_v28, 0.0 }
  0x9b   :  { %v122_v29 = vpop.f32.mrf.mxu0 }
  0x9c   :  { %v123_v30 = vadd.f32 %v122_v29, %v702_v20 }
  0x9e   :  { %v158_v32 = vmax.f32 %v123_v30, 0.0 }
  0xa0   :  { %v172_v33 = vpack.c.bf16 %v158_v32, %v157_v31 }
  0xa2   :  { %257 = vmatmul.bf16.gmra.mxu1 %v172_v33 }
  0xa3   :  { %v125_v34 = vpop.f32.mrf.mxu0 }
  0xa4   :  { %v126_v35 = vadd.f32 %v125_v34, %v702_v20 }
  0xa6   :  { %v159_v38 = vmax.f32 %v126_v35, 0.0 }
  0xab   :  { %v127_v36 = vpop.f32.mrf.mxu0 }
  0xac   :  { %v128_v37 = vadd.f32 %v127_v36, %v702_v20 }
  0xae   :  { %v160_v39 = vmax.f32 %v128_v37, 0.0 }
  0xb0   :  { %v173_v40 = vpack.c.bf16 %v160_v39, %v159_v38 }
  0xb2   :  { %262 = vmatmul.bf16.gmra.mxu1 %v173_v40 }
  0xb3   :  { %v130_v41 = vpop.f32.mrf.mxu0 }
  0xb4   :  { %v131_v42 = vadd.f32 %v130_v41, %v702_v20 }
  0xb6   :  { %v161_v45 = vmax.f32 %v131_v42, 0.0 }
  0xbb   :  { %v132_v43 = vpop.f32.mrf.mxu0 }
  0xbc   :  { %v133_v44 = vadd.f32 %v132_v43, %v702_v20 }
  0xbe   :  { %v162_v46 = vmax.f32 %v133_v44, 0.0 }
  0xc0   :  { %v174_v47 = vpack.c.bf16 %v162_v46, %v161_v45 }
  0xc2   :  { %267 = vmatmul.bf16.gmra.mxu1 %v174_v47 }
  0xc3   :  { %v135_v48 = vpop.f32.mrf.mxu0 }
  0xc4   :  { %v136_v49 = vadd.f32 %v135_v48, %v702_v20 }
  0xc6   :  { %v163_v52 = vmax.f32 %v136_v49, 0.0 }
  0xcb   :  { %v137_v50 = vpop.f32.mrf.mxu0 }
  0xcc   :  { %v138_v51 = vadd.f32 %v137_v50, %v702_v20 }
  0xce   :  { %v164_v53 = vmax.f32 %v138_v51, 0.0 }
  0xd0   :  { %v175_v54 = vpack.c.bf16 %v164_v53, %v163_v52 }
  0xd2   :  { %272 = vmatmul.bf16.gmra.mxu1 %v175_v54 }
  0xd3   :  { %v140_v55 = vpop.f32.mrf.mxu0 }
  0xd4   :  { %v141_v56 = vadd.f32 %v140_v55, %v702_v20 }
  0xd6   :  { %v165_v60 = vmax.f32 %v141_v56, 0.0 }
  0xdb   :  { %v142_v57 = vpop.f32.mrf.mxu0 }
  0xdc   :  { %v143_v58 = vadd.f32 %v142_v57, %v702_v20 }
  0xde   :  { %v166_v61 = vmax.f32 %v143_v58, 0.0 }
  0xe0   :  { %v176_v62 = vpack.c.bf16 %v166_v61, %v165_v60 }
  0xe2   :  { %277 = vmatmul.bf16.gmra.mxu1 %v176_v62 }
  0xe3   :  { %v145_v0 = vpop.f32.mrf.mxu0 }
  0xe4   :  { %v146_v3 = vadd.f32 %v145_v0, %v702_v20 }
  0xe6   :  { %v167_v7 = vmax.f32 %v146_v3, 0.0 }
  0xeb   :  { %v147_v4 = vpop.f32.mrf.mxu0 }
  0xec   :  { %v148_v5 = vadd.f32 %v147_v4, %v702_v20 }
  0xee   :  { %v168_v8 = vmax.f32 %v148_v5, 0.0 }
  0xf0   :  { %v177_v9 = vpack.c.bf16 %v168_v8, %v167_v7 }
  0xf2   :  { %282 = vmatmul.bf16.vlgmr.msra.gmra.mxu3 %v177_v9 }
  0xf3   :  { %v150_v11 = vpop.f32.mrf.mxu0 }
  0xf4   :  { %v151_v14 = vadd.f32 %v150_v11, %v702_v20 }
  0xf6   :  { %v169_v17 = vmax.f32 %v151_v14, 0.0  ;;  %v334_v14 = vperm.slane %v699_v18, 2 }
  0xfb   :  { %v152_v15 = vpop.f32.mrf.mxu0 }
  0xfc   :  { %v153_v16 = vadd.f32 %v152_v15, %v702_v20 }
  0xfe   :  { %v170_v19 = vmax.f32 %v153_v16, 0.0 }
 0x100   :  { %v178_v21 = vpack.c.bf16 %v170_v19, %v169_v17 }
 0x102   :  { %287 = vmatmul.bf16.gmra.mxu3 %v178_v21 }
 0x10f   :  { %v253_v22 = vpop.f32.mrf.mxu1 }
 0x110   :  { %v254_v24 = vadd.f32 %v253_v22, %v195_v23 }
 0x112   :  { %v293_v27 = vmax.f32 %v254_v24, 0.0 }
 0x117   :  { %v255_v25 = vpop.f32.mrf.mxu1 }
 0x118   :  { %v256_v26 = vadd.f32 %v255_v25, %v195_v23 }
 0x11a   :  { %v294_v28 = vmax.f32 %v256_v26, 0.0 }
 0x11c   :  { %v309_v29 = vpack.c.bf16 %v294_v28, %v293_v27 }
 0x11e   :  { %391 = vmatmul.bf16.vlgmr.msra.gmra.mxu2 %v309_v29 }
 0x11f   :  { %v258_v30 = vpop.f32.mrf.mxu1 }
 0x120   :  { %v259_v31 = vadd.f32 %v258_v30, %v195_v23 }
 0x122   :  { %v295_v34 = vmax.f32 %v259_v31, 0.0 }
 0x127   :  { %v260_v32 = vpop.f32.mrf.mxu1 }
 0x128   :  { %v261_v33 = vadd.f32 %v260_v32, %v195_v23 }
 0x12a   :  { %v296_v20 = vmax.f32 %v261_v33, 0.0 }
 0x12c   :  { %v310_v35 = vpack.c.bf16 %v296_v20, %v295_v34 }
 0x12e   :  { %396 = vmatmul.bf16.gmra.mxu2 %v310_v35 }
 0x12f   :  { %v263_v36 = vpop.f32.mrf.mxu1 }
 0x130   :  { %v264_v37 = vadd.f32 %v263_v36, %v195_v23 }
 0x132   :  { %v297_v40 = vmax.f32 %v264_v37, 0.0 }
 0x137   :  { %v265_v38 = vpop.f32.mrf.mxu1 }
 0x138   :  { %v266_v39 = vadd.f32 %v265_v38, %v195_v23 }
 0x13a   :  { %v298_v41 = vmax.f32 %v266_v39, 0.0 }
 0x13c   :  { %v311_v42 = vpack.c.bf16 %v298_v41, %v297_v40 }
 0x13e   :  { %401 = vmatmul.bf16.gmra.mxu2 %v311_v42 }
 0x13f   :  { %v268_v43 = vpop.f32.mrf.mxu1 }
 0x140   :  { %v269_v44 = vadd.f32 %v268_v43, %v195_v23 }
 0x142   :  { %v299_v47 = vmax.f32 %v269_v44, 0.0 }
 0x147   :  { %v270_v45 = vpop.f32.mrf.mxu1 }
 0x148   :  { %v271_v46 = vadd.f32 %v270_v45, %v195_v23 }
 0x14a   :  { %v300_v48 = vmax.f32 %v271_v46, 0.0 }
 0x14c   :  { %v312_v49 = vpack.c.bf16 %v300_v48, %v299_v47 }
 0x14e   :  { %406 = vmatmul.bf16.gmra.mxu2 %v312_v49 }
 0x14f   :  { %v273_v50 = vpop.f32.mrf.mxu1 }
 0x150   :  { %v274_v51 = vadd.f32 %v273_v50, %v195_v23 }
 0x152   :  { %v301_v54 = vmax.f32 %v274_v51, 0.0 }
 0x157   :  { %v275_v52 = vpop.f32.mrf.mxu1 }
 0x158   :  { %v276_v53 = vadd.f32 %v275_v52, %v195_v23 }
 0x15a   :  { %v302_v55 = vmax.f32 %v276_v53, 0.0 }
 0x15c   :  { %v313_v56 = vpack.c.bf16 %v302_v55, %v301_v54 }
 0x15e   :  { %411 = vmatmul.bf16.gmra.mxu2 %v313_v56 }
 0x15f   :  { %v278_v57 = vpop.f32.mrf.mxu1 }
 0x160   :  { %v279_v58 = vadd.f32 %v278_v57, %v195_v23 }
 0x162   :  { %v303_v61 = vmax.f32 %v279_v58, 0.0 }
 0x167   :  { %v280_v59 = vpop.f32.mrf.mxu1 }
 0x168   :  { %v281_v60 = vadd.f32 %v280_v59, %v195_v23 }
 0x16a   :  { %v304_v62 = vmax.f32 %v281_v60, 0.0 }
 0x16c   :  { %v314_v63 = vpack.c.bf16 %v304_v62, %v303_v61 }
 0x16e   :  { %416 = vmatmul.bf16.gmra.mxu2 %v314_v63 }
 0x175   :  { %v283_v0 = vpop.f32.mrf.mxu3 }
 0x176   :  { %v284_v1 = vadd.f32 %v283_v0, %v195_v23 }
 0x178   :  { %v305_v4 = vmax.f32 %v284_v1, 0.0 }
 0x17d   :  { %v285_v2 = vpop.f32.mrf.mxu3 }
 0x17e   :  { %v286_v3 = vadd.f32 %v285_v2, %v195_v23 }
 0x180   :  { %v306_v5 = vmax.f32 %v286_v3, 0.0 }
 0x182   :  { %v315_v6 = vpack.c.bf16 %v306_v5, %v305_v4 }
 0x184   :  { %421 = vmatmul.bf16.vlgmr.msrb.gmra.mxu3 %v315_v6 }
 0x185   :  { %v288_v7 = vpop.f32.mrf.mxu3 }
 0x186   :  { %v289_v8 = vadd.f32 %v288_v7, %v195_v23 }
 0x188   :  { %v307_v11 = vmax.f32 %v289_v8, 0.0 }
 0x18d   :  { %v290_v9 = vpop.f32.mrf.mxu3 }
 0x18e   :  { %v291_v10 = vadd.f32 %v290_v9, %v195_v23 }
 0x190   :  { %v308_v12 = vmax.f32 %v291_v10, 0.0 }
 0x192   :  { %v316_v13 = vpack.c.bf16 %v308_v12, %v307_v11 }
 0x194   :  { %426 = vmatmul.bf16.gmra.mxu3 %v316_v13 }
 0x1a1   :  { %v392_v15 = vpop.f32.mrf.mxu2 }
 0x1a2   :  { %v393_v16 = vadd.f32 %v392_v15, %v334_v14 }
 0x1a4   :  { %432 = vst [vmem:[%s798_s4] sm:$0xff] %v393_v16 }
 0x1a9   :  { %v394_v17 = vpop.f32.mrf.mxu2 }
 0x1aa   :  { %v395_v19 = vadd.f32 %v394_v17, %v334_v14 }
 0x1ac   :  { %433 = vst [vmem:[%s798_s4 + $0x8] sm:$0xff] %v395_v19 }
 0x1b1   :  { %v397_v21 = vpop.f32.mrf.mxu2 }
 0x1b2   :  { %v398_v22 = vadd.f32 %v397_v21, %v334_v14 }
 0x1b4   :  { %434 = vst [vmem:[%s798_s4 + $0x10] sm:$0xff] %v398_v22 }
 0x1b9   :  { %v399_v23 = vpop.f32.mrf.mxu2 }
 0x1ba   :  { %v400_v18 = vadd.f32 %v399_v23, %v334_v14 }
 0x1bc   :  { %435 = vst [vmem:[%s798_s4 + $0x18] sm:$0xff] %v400_v18 }
 0x1c1   :  { %v402_v24 = vpop.f32.mrf.mxu2 }
 0x1c2   :  { %v403_v25 = vadd.f32 %v402_v24, %v334_v14 }
 0x1c4   :  { %436 = vst [vmem:[%s798_s4 + $0x20] sm:$0xff] %v403_v25 }
 0x1c9   :  { %v404_v26 = vpop.f32.mrf.mxu2 }
 0x1ca   :  { %v405_v27 = vadd.f32 %v404_v26, %v334_v14 }
 0x1cc   :  { %437 = vst [vmem:[%s798_s4 + $0x28] sm:$0xff] %v405_v27 }
 0x1d1   :  { %v407_v28 = vpop.f32.mrf.mxu2 }
 0x1d2   :  { %v408_v29 = vadd.f32 %v407_v28, %v334_v14 }
 0x1d4   :  { %438 = vst [vmem:[%s798_s4 + $0x30] sm:$0xff] %v408_v29 }
 0x1d9   :  { %v409_v30 = vpop.f32.mrf.mxu2 }
 0x1da   :  { %v410_v31 = vadd.f32 %v409_v30, %v334_v14 }
 0x1dc   :  { %439 = vst [vmem:[%s798_s4 + $0x38] sm:$0xff] %v410_v31 }
 0x1e1   :  { %v412_v32 = vpop.f32.mrf.mxu2 }
 0x1e2   :  { %v413_v33 = vadd.f32 %v412_v32, %v334_v14 }
 0x1e4   :  { %440 = vst [vmem:[%s798_s4 + $0x40] sm:$0xff] %v413_v33 }
 0x1e9   :  { %v414_v34 = vpop.f32.mrf.mxu2 }
 0x1ea   :  { %v415_v20 = vadd.f32 %v414_v34, %v334_v14 }
 0x1ec   :  { %441 = vst [vmem:[%s798_s4 + $0x48] sm:$0xff] %v415_v20 }
 0x1f1   :  { %v417_v35 = vpop.f32.mrf.mxu2 }
 0x1f2   :  { %v418_v36 = vadd.f32 %v417_v35, %v334_v14 }
 0x1f4   :  { %442 = vst [vmem:[%s798_s4 + $0x50] sm:$0xff] %v418_v36 }
 0x1f9   :  { %v419_v37 = vpop.f32.mrf.mxu2 }
 0x1fa   :  { %v420_v38 = vadd.f32 %v419_v37, %v334_v14 }
 0x1fc   :  { %443 = vst [vmem:[%s798_s4 + $0x58] sm:$0xff] %v420_v38 }
 0x207   :  { %v422_v39 = vpop.f32.mrf.mxu3 }
 0x208   :  { %v423_v40 = vadd.f32 %v422_v39, %v334_v14 }
 0x20a   :  { %444 = vst [vmem:[%s798_s4 + $0x60] sm:$0xff] %v423_v40 }
 0x20f   :  { %v424_v41 = vpop.f32.mrf.mxu3 }
 0x210   :  { %v425_v42 = vadd.f32 %v424_v41, %v334_v14 }
 0x212   :  { %445 = vst [vmem:[%s798_s4 + $0x68] sm:$0xff] %v425_v42 }
 0x217   :  { %v427_v43 = vpop.f32.mrf.mxu3 }
 0x218   :  { %v428_v44 = vadd.f32 %v427_v43, %v334_v14 }
 0x21a   :  { %446 = vst [vmem:[%s798_s4 + $0x70] sm:$0xff] %v428_v44 }
 0x21f   :  { %v429_v45 = vpop.f32.mrf.mxu3 }
 0x220   :  { %v430_v46 = vadd.f32 %v429_v45, %v334_v14 }
 0x222   :  { %447 = vst [vmem:[%s798_s4 + $0x78] sm:$0xff] %v430_v46 }

</bundles_post_ra>
